<compile_context>
chip_gen: v7x
topology: tpu7x:2x2x1
jax: 0.10.0
libtpu: 0.0.40
codegen_flags: <defaults>
</compile_context>

<pallas_src>
import jax
import jax.numpy as jnp
from jax.experimental import pallas as pl
from jax.experimental.pallas import tpu as pltpu

# ------------------------- synthetic module hyper-params -------------------------
ESM_EMBED_DIM = 128     # stands in for the real 1280 (multiple of 128 -> lane-dense)
AF2_DIM       = 256     # alphafold2.dim (multiple of 128 -> unmasked vst)
VOCAB         = 24      # amino-acid alphabet size (synthetic)
TABLE_ROWS    = 32      # vocab padded to a multiple of 8 sublanes (clean MXU K dim)

# Max rows per grid step.  2048 keeps the ~0.35us/step pipeline overhead < ~20%
# of the ~1 MiB bf16 output DMA per step.
MAX_ROW_TILE = 2048


# ------------------------------- Pallas kernel -----------------------------------
def _gather_project_kernel(tok_ref, fused_ref, o_ref):
    """One grid step:  out[r, :] = fused[tok[r], :]  for a tile of rows.

    tok_ref   : (1, T)          int32  lane-dense token tile
    fused_ref : (TABLE_ROWS, D) bf16   pre-folded (table @ W^T + bias)
    o_ref     : (T, D)          bf16
    """
    vocab = fused_ref.shape[0]
    tile = tok_ref.shape[1]

    # Transposed one-hot, built without any cross-lane relayout of the tokens:
    # one_hot_t[v, r] = (tok[r] == v).  tok (1,T) broadcasts over sublanes.
    iota_v = jax.lax.broadcasted_iota(jnp.int32, (vocab, tile), 0)       # (V, T)
    one_hot_t = (tok_ref[...] == iota_v).astype(fused_ref.dtype)         # (V, T) bf16 0/1

    # out = one_hot_t^T @ fused  (contract the tiny V=32 dim; MXU, f32 accumulate).
    # Exact: each output row is a plain bf16 table-row select.
    acc = jax.lax.dot_general(
        one_hot_t, fused_ref[...],
        dimension_numbers=(((0,), (0,)), ((), ())),
        preferred_element_type=jnp.float32)                              # (T, D) f32
    o_ref[...] = acc.astype(o_ref.dtype)                                 # bf16 store


# ------------------------------ pallas_call wrapper -------------------------------
def _pick_row_tile(rows: int) -> int:
    if rows < 256:
        # Tiny input: one block that covers the arrays exactly (block == full dims,
        # so no (8,128) divisibility requirement and no padding/edge handling).
        return rows
    # Large input: lane-aligned tile, capped at MAX_ROW_TILE, and <= rows//2 so the
    # grid has >=2 steps for the "parallel" axis (both TensorCores on v7x).
    return min(MAX_ROW_TILE, max(128, ((rows // 2) // 128) * 128))


def fused_gather_project(tokens_flat, fused):
    """tokens_flat: (rows,) int32 ; fused: (TABLE_ROWS, D) bf16 -> (rows, D) bf16."""
    rows = tokens_flat.shape[0]
    vocab, d = fused.shape

    row_tile = _pick_row_tile(rows)
    grid_n = pl.cdiv(rows, row_tile)

    # Pad ONLY the tiny int32 token vector so every token block is in-bounds
    # (pad tokens are 0 -> valid vocab entry; their output rows fall in the
    # masked OOB tail of the last output block and are never written back).
    tok_padded = grid_n * row_tile
    toks = tokens_flat.astype(jnp.int32)
    if tok_padded != rows:
        toks = jnp.concatenate(
            [toks, jnp.zeros((tok_padded - rows,), jnp.int32)], axis=0)
    toks_2d = toks.reshape(1, tok_padded)                 # lane-dense token row

    return pl.pallas_call(
        _gather_project_kernel,
        # EXACT row count -> the caller's reshape to (b,n,D)/(b,m,n,D) is zero-copy.
        out_shape=jax.ShapeDtypeStruct((rows, d), jnp.bfloat16),
        grid_spec=pltpu.PrefetchScalarGridSpec(
            num_scalar_prefetch=0,
            grid=(grid_n,),
            in_specs=[
                pl.BlockSpec((1, row_tile), lambda i: (0, i)),     # token tile
                pl.BlockSpec((vocab, d), lambda i: (0, 0)),        # fused table (resident)
            ],
            out_specs=pl.BlockSpec((row_tile, d), lambda i: (i, 0)),
        ),
        compiler_params=pltpu.CompilerParams(
            # Row-tile axis sharded across the 2 TensorCores on v7x; neutral on
            # v5e/v6e (1 TC).
            dimension_semantics=("parallel",),
        ),
    )(toks_2d, fused)


# --------------------------- wrapper (glue in plain JAX) --------------------------
def _forward(params, seq, msa):
    """Jitted forward: one fused gather+project pallas_call per token tensor."""
    fused = params["fused"]

    b, n = seq.shape
    seq_embeds = fused_gather_project(seq.reshape(-1), fused).reshape(b, n, AF2_DIM)

    msa_embeds = None
    if msa is not None:
        bb, m, nn = msa.shape                     # 'b m n -> (b m) n' -> flat rows
        msa_embeds = fused_gather_project(msa.reshape(-1), fused)
        msa_embeds = msa_embeds.reshape(bb, m, nn, AF2_DIM)

    # TODO(synk): the real forward ends with self.alphafold2(seq, msa,
    # seq_embed=seq_embeds, msa_embed=msa_embeds); the trunk is an external
    # sub-module, so the projected embeddings are returned instead.
    return seq_embeds, msa_embeds


class ESMEmbedWrapperPallas:
    def __init__(self, key):
        k_tab, k_w, k_b = jax.random.split(key, 3)
        # TODO(synk): get_esm_embedd runs the external torch.hub ESM transformer;
        # it is stood in for by a learned embedding table over the AA vocabulary.
        # Tokens must satisfy 0 <= tok < TABLE_ROWS (guaranteed by the synthetic
        # vocab; add a clamp/guard if real ESM token ids are ever fed in).
        table = jax.random.normal(k_tab, (TABLE_ROWS, ESM_EMBED_DIM), jnp.float32)
        # PyTorch nn.Linear(ESM_EMBED_DIM, AF2_DIM): weight (out, in), bias (out,).
        w = jax.random.normal(k_w, (AF2_DIM, ESM_EMBED_DIM), jnp.float32) * 0.05
        bias = jax.random.normal(k_b, (AF2_DIM,), jnp.float32) * 0.05

        # Fold the Linear projection into the stand-in table ONCE (f32 math,
        # highest precision), then store bf16 for the MXU / bf16 output path.
        fused = jnp.einsum("ve,de->vd", table, w,
                           precision=jax.lax.Precision.HIGHEST) + bias
        self.params = {"fused": fused.astype(jnp.bfloat16)}
        # Unfused f32 parameters kept only for the reference checks below.
        self._ref = {"table": table, "weight": w, "bias": bias}
        self._fwd = jax.jit(_forward)

    def __call__(self, seq, msa=None):
        return self._fwd(self.params, seq, msa)


# --------------------------------------- main -------------------------------------
if __name__ == "__main__":
    key = jax.random.PRNGKey(0)
    k_params, k_seq, k_msa = jax.random.split(key, 3)

    wrapper = ESMEmbedWrapperPallas(k_params)

    b, m, n = 2, 3, 8
    seq = jax.random.randint(k_seq, (b, n), 0, VOCAB, dtype=jnp.int32)
    msa = jax.random.randint(k_msa, (b, m, n), 0, VOCAB, dtype=jnp.int32)

    seq_embeds, msa_embeds = wrapper(seq, msa)
    jax.block_until_ready(seq_embeds)
    jax.block_until_ready(msa_embeds)

    assert seq_embeds.shape == (b, n, AF2_DIM)
    assert msa_embeds.shape == (b, m, n, AF2_DIM)
    assert seq_embeds.dtype == jnp.bfloat16
    assert msa_embeds.dtype == jnp.bfloat16

    # 1) Tight check against the bf16 fused table: the kernel's one-hot @ fused is
    #    an exact row select (bf16 products of 1.0 are exact in f32, cast back is
    #    exact), so the outputs must match a plain take() of the bf16 fused rows.
    fused_bf16 = wrapper.params["fused"]
    seq_exact = jnp.take(fused_bf16, seq, axis=0).astype(jnp.float32)
    msa_exact = jnp.take(fused_bf16, msa, axis=0).astype(jnp.float32)
    assert jnp.allclose(seq_embeds.astype(jnp.float32), seq_exact, atol=1e-6, rtol=0)
    assert jnp.allclose(msa_embeds.astype(jnp.float32), msa_exact, atol=1e-6, rtol=0)

    # 2) Loose check against the original two-step f32 semantics
    #    (embedding lookup -> Linear); tolerance covers one bf16 rounding of the
    #    folded table (bf16 output was adopted, so tolerances were re-derived).
    table, w, bias = wrapper._ref["table"], wrapper._ref["weight"], wrapper._ref["bias"]
    seq_ref = jnp.einsum("bne,de->bnd", jnp.take(table, seq, axis=0), w,
                         precision=jax.lax.Precision.HIGHEST) + bias
    msa_ref = jnp.einsum("bmne,de->bmnd", jnp.take(table, msa, axis=0), w,
                         precision=jax.lax.Precision.HIGHEST) + bias
    assert jnp.allclose(seq_embeds.astype(jnp.float32), seq_ref, atol=2e-2, rtol=2e-2)
    assert jnp.allclose(msa_embeds.astype(jnp.float32), msa_ref, atol=2e-2, rtol=2e-2)

    print("KERNEL_OK")
</pallas_src>

<mosaic_0001>
module attributes {stable_mosaic.version = 11 : i64} {
  func.func @_gather_project_kernel(%arg0: i32, %arg1: memref<1x16xi32, #tpu.memory_space<vmem>>, %arg2: memref<32x256xbf16, #tpu.memory_space<vmem>>, %arg3: memref<16x256xbf16, #tpu.memory_space<vmem>>) attributes {dimension_semantics = [#tpu.dimension_semantics<parallel>], iteration_bounds = array<i64: 1>, scalar_prefetch = 0 : i64, scratch_operands = 0 : i64, tpu.core_type = #tpu.core_type<tc>, window_params = [{transform_indices = @transform_0, window_bounds = array<i64: 1, 16>}, {pipeline_mode = #tpu.pipeline_mode<synchronous>, transform_indices = @transform_1, window_bounds = array<i64: 32, 256>}, {transform_indices = @transform_2, window_bounds = array<i64: 16, 256>}]} {
    %0 = tpu.iota {dimensions = array<i32: 0>} : vector<32x16xi32>
    %c0 = arith.constant 0 : index
    %c0_0 = arith.constant 0 : index
    %1 = vector.load %arg1[%c0, %c0_0] : memref<1x16xi32, #tpu.memory_space<vmem>>, vector<1x16xi32>
    %2 = vector.broadcast %1 : vector<1x16xi32> to vector<32x16xi32>
    %3 = arith.cmpi eq, %2, %0 : vector<32x16xi32>
    %4 = arith.extui %3 : vector<32x16xi1> to vector<32x16xi32>
    %5 = arith.sitofp %4 : vector<32x16xi32> to vector<32x16xf32>
    %6 = arith.truncf %5 : vector<32x16xf32> to vector<32x16xbf16>
    %c0_1 = arith.constant 0 : index
    %c0_2 = arith.constant 0 : index
    %7 = vector.load %arg2[%c0_1, %c0_2] : memref<32x256xbf16, #tpu.memory_space<vmem>>, vector<32x256xbf16>
    %cst = arith.constant dense<0.000000e+00> : vector<16x256xf32>
    %8 = tpu.matmul %6, %7, %cst {dimension_numbers = #tpu.dot_dimension_numbers<[0], [0], [1], [1], [0, 1, 1, 1], [], []>} : vector<32x16xbf16>, vector<32x256xbf16>, vector<16x256xf32> -> vector<16x256xf32>
    %9 = arith.truncf %8 : vector<16x256xf32> to vector<16x256xbf16>
    %c0_3 = arith.constant 0 : index
    %c0_4 = arith.constant 0 : index
    %10 = vector.load %arg3[%c0_3, %c0_4] : memref<16x256xbf16, #tpu.memory_space<vmem>>, vector<16x256xbf16>
    tpu.vector_store %arg3[%c0_3, %c0_4], %9 {strides = array<i32>} : memref<16x256xbf16, #tpu.memory_space<vmem>>, vector<16x256xbf16>,
    return
  }
  func.func @transform_0(%arg0: i32) -> (i32, i32) {
    %c0_i32 = arith.constant 0 : i32
    %c0_i32_0 = arith.constant 0 : i32
    return %c0_i32, %arg0 : i32, i32
  }
  func.func @transform_1(%arg0: i32) -> (i32, i32) {
    %c0_i32 = arith.constant 0 : i32
    %c0_i32_0 = arith.constant 0 : i32
    %c0_i32_1 = arith.constant 0 : i32
    return %c0_i32, %c0_i32_0 : i32, i32
  }
  func.func @transform_2(%arg0: i32) -> (i32, i32) {
    %c0_i32 = arith.constant 0 : i32
    %c0_i32_0 = arith.constant 0 : i32
    return %arg0, %c0_i32 : i32, i32
  }
}

module attributes {stable_mosaic.version = 11 : i64} {
  func.func @_gather_project_kernel(%arg0: i32, %arg1: memref<1x48xi32, #tpu.memory_space<vmem>>, %arg2: memref<32x256xbf16, #tpu.memory_space<vmem>>, %arg3: memref<48x256xbf16, #tpu.memory_space<vmem>>) attributes {dimension_semantics = [#tpu.dimension_semantics<parallel>], iteration_bounds = array<i64: 1>, scalar_prefetch = 0 : i64, scratch_operands = 0 : i64, tpu.core_type = #tpu.core_type<tc>, window_params = [{transform_indices = @transform_0, window_bounds = array<i64: 1, 48>}, {pipeline_mode = #tpu.pipeline_mode<synchronous>, transform_indices = @transform_1, window_bounds = array<i64: 32, 256>}, {transform_indices = @transform_2, window_bounds = array<i64: 48, 256>}]} {
    %0 = tpu.iota {dimensions = array<i32: 0>} : vector<32x48xi32>
    %c0 = arith.constant 0 : index
    %c0_0 = arith.constant 0 : index
    %1 = vector.load %arg1[%c0, %c0_0] : memref<1x48xi32, #tpu.memory_space<vmem>>, vector<1x48xi32>
    %2 = vector.broadcast %1 : vector<1x48xi32> to vector<32x48xi32>
    %3 = arith.cmpi eq, %2, %0 : vector<32x48xi32>
    %4 = arith.extui %3 : vector<32x48xi1> to vector<32x48xi32>
    %5 = arith.sitofp %4 : vector<32x48xi32> to vector<32x48xf32>
    %6 = arith.truncf %5 : vector<32x48xf32> to vector<32x48xbf16>
    %c0_1 = arith.constant 0 : index
    %c0_2 = arith.constant 0 : index
    %7 = vector.load %arg2[%c0_1, %c0_2] : memref<32x256xbf16, #tpu.memory_space<vmem>>, vector<32x256xbf16>
    %cst = arith.constant dense<0.000000e+00> : vector<48x256xf32>
    %8 = tpu.matmul %6, %7, %cst {dimension_numbers = #tpu.dot_dimension_numbers<[0], [0], [1], [1], [0, 1, 1, 1], [], []>} : vector<32x48xbf16>, vector<32x256xbf16>, vector<48x256xf32> -> vector<48x256xf32>
    %9 = arith.truncf %8 : vector<48x256xf32> to vector<48x256xbf16>
    %c0_3 = arith.constant 0 : index
    %c0_4 = arith.constant 0 : index
    %10 = vector.load %arg3[%c0_3, %c0_4] : memref<48x256xbf16, #tpu.memory_space<vmem>>, vector<48x256xbf16>
    tpu.vector_store %arg3[%c0_3, %c0_4], %9 {strides = array<i32>} : memref<48x256xbf16, #tpu.memory_space<vmem>>, vector<48x256xbf16>,
    return
  }
  func.func @transform_0(%arg0: i32) -> (i32, i32) {
    %c0_i32 = arith.constant 0 : i32
    %c0_i32_0 = arith.constant 0 : i32
    return %c0_i32, %arg0 : i32, i32
  }
  func.func @transform_1(%arg0: i32) -> (i32, i32) {
    %c0_i32 = arith.constant 0 : i32
    %c0_i32_0 = arith.constant 0 : i32
    %c0_i32_1 = arith.constant 0 : i32
    return %c0_i32, %c0_i32_0 : i32, i32
  }
  func.func @transform_2(%arg0: i32) -> (i32, i32) {
    %c0_i32 = arith.constant 0 : i32
    %c0_i32_0 = arith.constant 0 : i32
    return %arg0, %c0_i32 : i32, i32
  }
}

</mosaic_0001>

<bundles_post_ra>
// kernel: _forward.2
= control target key start
LH: loop header
LB: loop body
LE: loop exit
PB: predicated region body
PF: predicated region fallthrough
CT: control target
= control target key end

     0   :  { %v13_v0 = vlaneseq  ;;  %v203_v4 = vmov 0   ;;  %s250_s0 = inlined_call_operand.vmem [shape: s32[1,16], index: 0, kind: input, shape index: {}]   ;;  %s251_s1 = inlined_call_operand.vmem [shape: bf16[32,256], index: 1, kind: input, shape index: {}]   ;;  %s252_s2 = inlined_call_operand.hbm [shape: bf16[16,256], index: 2, kind: output, shape index: {}]  }
   0x1   :  { %v154_v1 = vld [vmem:[%s250_s0] ss:$0 sm:$0xff]  ;;  %v173_v2 = vld [vmem:[%s251_s1 + $0x4] ss:$8 sps:$4 sm:$0xff]   ;;  %113 = vmatprep.mubr.bf16.mxu0 %v203_v4  ;;  %v176_v6 = vld [vmem:[%s251_s1 + $0x14] ss:$8 sps:$4 sm:$0xff]  }
   0x2   :  { %v175_v3 = vld [vmem:[%s251_s1] ss:$8 sps:$4 sm:$0xff]   ;;  %v14_v5 = vshrl.u32 %v13_v0, 7  ;;  %81 = vmatprep.subr.bf16.mxu0 %v173_v2 }
   0x3   :  { %7 = vsyncpa [#allocation3], 0  ;;  %82 = vmatpush1.bf16.msra.mxu0 %v175_v3  ;;  %v178_v10 = vld [vmem:[%s251_s1 + $0x10] ss:$8 sps:$4 sm:$0xff]   ;;  %v204_v11 = vmov 0.0   ;;  %vm77_vm4 = vcmask 261120  }
   0x4   :  { %v15_v7 = vadd.s32 8, %v14_v5  ;;  %vm23_vm0 = vcmp.eq.s32.totalorder %v154_v1, %v14_v5  ;;  %v16_v8 = vadd.s32 16, %v14_v5  ;;  %v17_v9 = vadd.s32 24, %v14_v5  ;;  %83 = vmatprep.subr.bf16.mxu0 %v176_v6  ;;  %s205_s18 = smov [#allocation2]  }
   0x5   :  { %v155_v12 = vsel %vm23_vm0, 1.0, %v204_v11  ;;  %s143_s1 = sshll.u32 %s205_s18, 4  ;;  %s144_s1 = int_to_ptr.vmem [resolvable:$true] %s143_s1 }
   0x6   :  { %vm24_vm1 = vcmp.eq.s32.totalorder %v154_v1, %v15_v7  ;;  %vm25_vm2 = vcmp.eq.s32.totalorder %v154_v1, %v16_v8  ;;  %vm26_vm3 = vcmp.eq.s32.totalorder %v154_v1, %v17_v9  ;;  %s179_s19 = scalar_lea.vmem %s144_s1, 256  ;;  %p184_p1 = scmp.lt.s32.totalorder %s144_s1, %s144_s1 }
   0x7   :  { %v156_v13 = vsel %vm24_vm1, 1.0, %v204_v11  ;;  %v157_v14 = vsel %vm25_vm2, 1.0, %v204_v11  ;;  %v158_v15 = vsel %vm26_vm3, 1.0, %v204_v11  ;;  %84 = vmatpush1.bf16.msra.mxu0 %v178_v10  ;;  %p180_p0 = scmp.ne.s32.totalorder %s144_s1, %s179_s19  ;;  %p185_p2 = scmp.lt.s32.totalorder %s179_s19, %s179_s19 }
   0x8   :  { %v35_v16 = vpack.c.bf16 %v156_v13, %v155_v12  ;;  %v36_v17 = vpack.c.bf16 %v158_v15, %v157_v14 }
   0x9   :  { %p186_p3 = por %p185_p2, %p184_p1 }
   0xa   :  { %41 = vxpose.xlu0.c.b16.start [1/2] (short) (narrow) %v35_v16, 16 }
   0xb   :  { %p187_p4 = pnand %p186_p3, %p180_p0 }
   0xe   :  { %42 = vxpose.xlu0.c.b16.end [2/2] (short) (narrow) %v36_v17, 16 }
  0x70   :  { %v49_v18 = vpop.trf.xlu0 }
  0x71   :  { %163 = vmatmul.mubr.msk.bf16.vlgmr.msra.gmra.mrb[0].mxu0 %vm77_vm4, %v49_v18 }
 0x144   :  { %v115_v19 = vpop.f32.mrb[0].mxu0 }
 0x145   :  { %v117_v20 = vpop.f32.mrb[1].mxu0 }
 0x146   :  { %v166_v21 = vpack.c.bf16 %v117_v20, %v115_v19  ;;  %v119_v22 = vpop.f32.mrb[2].mxu0 }
 0x147   :  { %v121_v23 = vpop.f32.mrb[3].mxu0 }
 0x148   :  { %136 = vst [vmem:[#allocation2] sm:$0xff] %v166_v21  ;;  %v167_v24 = vpack.c.bf16 %v121_v23, %v119_v22 }
 0x14a   :  { %137 = vst [vmem:[#allocation2 + $0x8] sm:$0xff] %v167_v24 }
 0x14b   :  { %190 = shalt.err (!%p187_p4)
}
 0x14c   :  { %s191_s22 = scalar_lea.hbm %s252_s2, 256 }
 0x14d   :  { %p192_p5 = scmp.ne.s32.totalorder %s252_s2, %s191_s22  ;;  %p195_p6 = scmp.lt.u32.totalorder %s191_s22, %s252_s2 }
 0x14f   :  { %p197_p7 = pnand %p195_p6, %p192_p5 }
 0x151   :  { %200 = shalt.err (!%p197_p7)
}
 0x152   :  { %s206_s27 = smov 128   ;;  %s207_s28 = smov 8  }
 0x153   :  { %149 = dma.vmem_to_hbm [thread:$0]  %s144_s1, 256, %s252_s2, [#allocation3], %s206_s27, %s206_s27, %s207_s28  }
 0x154   :  { %201 = dma.done.wait [#allocation3], 256  }
 0x155   :  { %202 = vsyncadd [#allocation3], 4294967040 }
 0x156   :  { %153 = vsyncpa [#allocation3], 1 }

// kernel: _forward.3
= control target key start
LH: loop header
LB: loop body
LE: loop exit
PB: predicated region body
PF: predicated region fallthrough
CT: control target
= control target key end

     0   :  { %v13_v0 = vlaneseq  ;;  %v271_v4 = vmov 0   ;;  %s318_s0 = inlined_call_operand.vmem [shape: s32[1,48], index: 0, kind: input, shape index: {}]   ;;  %s319_s1 = inlined_call_operand.vmem [shape: bf16[32,256], index: 1, kind: input, shape index: {}]   ;;  %s320_s2 = inlined_call_operand.hbm [shape: bf16[48,256], index: 2, kind: output, shape index: {}]  }
   0x1   :  { %v208_v1 = vld [vmem:[%s318_s0] ss:$0 sm:$0xff]  ;;  %v241_v2 = vld [vmem:[%s319_s1 + $0x4] ss:$8 sps:$4 sm:$0xff]   ;;  %119 = vmatprep.mubr.bf16.mxu0 %v271_v4  ;;  %129 = vmatprep.mubr.bf16.mxu1 %v271_v4  ;;  %v244_v6 = vld [vmem:[%s319_s1 + $0x14] ss:$8 sps:$4 sm:$0xff]  }
   0x2   :  { %v243_v3 = vld [vmem:[%s319_s1] ss:$8 sps:$4 sm:$0xff]   ;;  %v14_v5 = vshrl.u32 %v13_v0, 7  ;;  %87 = vmatprep.subr.bf16.mxu0 %v241_v2  ;;  %232 = vmatprep.subr.bf16.mxu1 %v241_v2 }
   0x3   :  { %7 = vsyncpa [#allocation3], 0  ;;  %88 = vmatpush1.bf16.msra.mxu0 %v243_v3  ;;  %234 = vmatpush1.bf16.msra.mxu1 %v243_v3  ;;  %v246_v10 = vld [vmem:[%s319_s1 + $0x10] ss:$8 sps:$4 sm:$0xff]   ;;  %v272_v11 = vmov 0.0   ;;  %vm77_vm4 = vcmask 261120  }
   0x4   :  { %v15_v7 = vadd.s32 8, %v14_v5  ;;  %vm23_vm0 = vcmp.eq.s32.totalorder %v208_v1, %v14_v5  ;;  %v16_v8 = vadd.s32 16, %v14_v5  ;;  %v17_v9 = vadd.s32 24, %v14_v5  ;;  %89 = vmatprep.subr.bf16.mxu0 %v244_v6  ;;  %233 = vmatprep.subr.bf16.mxu1 %v244_v6  ;;  %s273_s1 = smov [#allocation2]  }
   0x5   :  { %v209_v12 = vsel %vm23_vm0, 1.0, %v272_v11  ;;  %s197_s18 = sshll.u32 %s273_s1, 4  ;;  %s198_s18 = int_to_ptr.vmem [resolvable:$true] %s197_s18 }
   0x6   :  { %vm24_vm1 = vcmp.eq.s32.totalorder %v208_v1, %v15_v7  ;;  %vm25_vm2 = vcmp.eq.s32.totalorder %v208_v1, %v16_v8  ;;  %vm26_vm3 = vcmp.eq.s32.totalorder %v208_v1, %v17_v9  ;;  %s247_s19 = scalar_lea.vmem %s198_s18, 768  ;;  %p252_p1 = scmp.lt.s32.totalorder %s198_s18, %s198_s18 }
   0x7   :  { %v210_v13 = vsel %vm24_vm1, 1.0, %v272_v11  ;;  %v211_v14 = vsel %vm25_vm2, 1.0, %v272_v11  ;;  %v212_v15 = vsel %vm26_vm3, 1.0, %v272_v11  ;;  %90 = vmatpush1.bf16.msra.mxu0 %v246_v10  ;;  %235 = vmatpush1.bf16.msra.mxu1 %v246_v10  ;;  %p248_p0 = scmp.ne.s32.totalorder %s198_s18, %s247_s19  ;;  %p253_p2 = scmp.lt.s32.totalorder %s247_s19, %s247_s19 }
   0x8   :  { %v35_v16 = vpack.c.bf16 %v210_v13, %v209_v12  ;;  %v36_v17 = vpack.c.bf16 %v212_v15, %v211_v14 }
   0x9   :  { %p254_p3 = por %p253_p2, %p252_p1 }
   0xa   :  { %41 = vxpose.xlu0.c.b16.start [1/2] (short) (narrow) %v35_v16, 48 }
   0xb   :  { %p255_p4 = pnand %p254_p3, %p248_p0 }
   0xe   :  { %42 = vxpose.xlu0.c.b16.end [2/2] (short) (narrow) %v36_v17, 48 }
  0x70   :  { %v49_v18 = vpop.trf.xlu0 }
  0x71   :  { %217 = vmatmul.mubr.msk.bf16.vlgmr.msra.gmra.mrb[0].mxu0 %vm77_vm4, %v49_v18 }
  0x74   :  { %v50_v19 = vpop.trf.xlu0 }
  0x75   :  { %218 = vmatmul.mubr.msk.bf16.vlgmr.msra.gmra.mrb[0].mxu1 %vm77_vm4, %v50_v19 }
  0x76   :  { %139 = vmatprep.mubr.bf16.mxu1 %v271_v4 }
  0x78   :  { %v51_v20 = vpop.trf.xlu0 }
  0x7d   :  { %219 = vmatmul.mubr.msk.bf16.gmra.mrb[4].mxu1 %vm77_vm4, %v51_v20 }
 0x144   :  { %v121_v21 = vpop.f32.mrb[0].mxu0 }
 0x145   :  { %v123_v22 = vpop.f32.mrb[1].mxu0 }
 0x146   :  { %v226_v23 = vpack.c.bf16 %v123_v22, %v121_v21  ;;  %v125_v24 = vpop.f32.mrb[2].mxu0 }
 0x147   :  { %v127_v25 = vpop.f32.mrb[3].mxu0 }
 0x148   :  { %186 = vst [vmem:[#allocation2] sm:$0xff] %v226_v23  ;;  %v227_v26 = vpack.c.bf16 %v127_v25, %v125_v24  ;;  %v131_v27 = vpop.f32.mrb[0].mxu1 }
 0x149   :  { %v133_v28 = vpop.f32.mrb[1].mxu1 }
 0x14a   :  { %187 = vst [vmem:[#allocation2 + $0x8] sm:$0xff] %v227_v26  ;;  %v228_v29 = vpack.c.bf16 %v133_v28, %v131_v27  ;;  %v135_v30 = vpop.f32.mrb[2].mxu1 }
 0x14b   :  { %v137_v31 = vpop.f32.mrb[3].mxu1 }
 0x14c   :  { %188 = vst [vmem:[#allocation2 + $0x10] sm:$0xff] %v228_v29  ;;  %v229_v32 = vpack.c.bf16 %v137_v31, %v135_v30 }
 0x14e   :  { %189 = vst [vmem:[#allocation2 + $0x18] sm:$0xff] %v229_v32 }
 0x150   :  { %v141_v33 = vpop.f32.mrb[4].mxu1 }
 0x151   :  { %v143_v34 = vpop.f32.mrb[5].mxu1 }
 0x152   :  { %v230_v35 = vpack.c.bf16 %v143_v34, %v141_v33  ;;  %v145_v36 = vpop.f32.mrb[6].mxu1 }
 0x153   :  { %v147_v37 = vpop.f32.mrb[7].mxu1 }
 0x154   :  { %190 = vst [vmem:[#allocation2 + $0x20] sm:$0xff] %v230_v35  ;;  %v231_v38 = vpack.c.bf16 %v147_v37, %v145_v36 }
 0x156   :  { %191 = vst [vmem:[#allocation2 + $0x28] sm:$0xff] %v231_v38 }
 0x157   :  { %258 = shalt.err (!%p255_p4)
}
 0x158   :  { %s259_s22 = scalar_lea.hbm %s320_s2, 768 }
 0x159   :  { %p260_p5 = scmp.ne.s32.totalorder %s320_s2, %s259_s22  ;;  %p263_p6 = scmp.lt.u32.totalorder %s259_s22, %s320_s2 }
 0x15b   :  { %p265_p7 = pnand %p263_p6, %p260_p5 }
 0x15d   :  { %268 = shalt.err (!%p265_p7)
}
 0x15e   :  { %s274_s27 = smov 128   ;;  %s275_s28 = smov 8  }
 0x15f   :  { %203 = dma.vmem_to_hbm [thread:$0]  %s198_s18, 768, %s320_s2, [#allocation3], %s274_s27, %s274_s27, %s275_s28  }
 0x160   :  { %269 = dma.done.wait [#allocation3], 768  }
 0x161   :  { %270 = vsyncadd [#allocation3], 4294966528 }
 0x162   :  { %207 = vsyncpa [#allocation3], 1 }

</bundles_post_ra>
